<compile_context>
chip_gen: v7x
topology: tpu7x:2x2x1
jax: 0.10.0
libtpu: 0.0.40
codegen_flags: <defaults>
</compile_context>

<pallas_src>
from functools import partial

import numpy as np
import jax
import jax.numpy as jnp
from jax.experimental import pallas as pl
from jax.experimental.pallas import tpu as pltpu


def _round_up(v, m):
    return (v + m - 1) // m * m


# ------------------------------- kernel ---------------------------------------

def _bag_kernel(x_ref, w1_ref, b1_ref, m_ref, cnt_ref, w2_ref, b2_ref,
                out_ref, acc_ref):
    i = pl.program_id(0)

    @pl.when(i == 0)
    def _init():
        acc_ref[...] = jnp.zeros_like(acc_ref)

    # prepNN: Linear(D, H) + ReLU on this tile of instances.
    # bf16 MXU operands, f32 accumulation; bias add + ReLU in f32.
    h = jnp.dot(x_ref[...], w1_ref[...], preferred_element_type=jnp.float32)
    h = jnp.maximum(h + b1_ref[...], 0.0)

    # Per-bag SUM of this tile's instances.  Membership tile is bag-major
    # (B_p, block_n) int8 0/1 (lane-dense); upcast to bf16 (exact for 0/1)
    # and contract in the canonical [M,K]x[K,N] MXU orientation, f32 accum.
    m = m_ref[...].astype(jnp.bfloat16)
    acc_ref[...] += jnp.dot(m, h.astype(jnp.bfloat16),
                            preferred_element_type=jnp.float32)

    @pl.when(i == pl.num_programs(0) - 1)
    def _finalize():
        # mean = sum / count in f32 (sum-then-divide, matches torch.mean),
        # then afterNN: Linear(H, C); store a lane-dense (B_p, C_p) f32 block.
        agg = acc_ref[...] / cnt_ref[...]
        out_ref[...] = jnp.dot(agg.astype(jnp.bfloat16), w2_ref[...],
                               preferred_element_type=jnp.float32) + b2_ref[...]


# ----------------------------- pallas wrapper ---------------------------------

@partial(jax.jit,
         static_argnames=("block_n", "single_buffer_residents", "vmem_limit"))
def _bag_pallas(x_p, w1_p, b1_p, m_p, cnt_p, w2_p, b2_p, *,
                block_n, single_buffer_residents, vmem_limit):
    N_p, D = x_p.shape
    H_p = w1_p.shape[1]
    B_p = cnt_p.shape[0]
    C_p = w2_p.shape[1]
    n_tiles = N_p // block_n

    # Constant-index (resident) operands: single buffer if supported.
    res_kw = ({"pipeline_mode": pl.Buffered(1)}
              if single_buffer_residents else {})

    return pl.pallas_call(
        _bag_kernel,
        out_shape=jax.ShapeDtypeStruct((B_p, C_p), jnp.float32),
        grid_spec=pltpu.PrefetchScalarGridSpec(
            num_scalar_prefetch=0,
            grid=(n_tiles,),
            in_specs=[
                pl.BlockSpec((block_n, D), lambda i: (i, 0)),            # x tile (streamed)
                pl.BlockSpec((D, H_p), lambda i: (0, 0), **res_kw),      # W1 (resident)
                pl.BlockSpec((1, H_p), lambda i: (0, 0), **res_kw),      # b1 (resident)
                pl.BlockSpec((B_p, block_n), lambda i: (0, i)),          # membership tile (streamed)
                pl.BlockSpec((B_p, 1), lambda i: (0, 0), **res_kw),      # counts (resident)
                pl.BlockSpec((H_p, C_p), lambda i: (0, 0), **res_kw),    # W2 (resident)
                pl.BlockSpec((1, C_p), lambda i: (0, 0), **res_kw),      # b2 (resident)
            ],
            out_specs=pl.BlockSpec((B_p, C_p), lambda i: (0, 0)),
            scratch_shapes=[pltpu.VMEM((B_p, H_p), jnp.float32)],
        ),
        compiler_params=pltpu.CompilerParams(
            dimension_semantics=("arbitrary",),   # N axis is the reduction
            vmem_limit_bytes=vmem_limit,
        ),
    )(x_p, w1_p, b1_p, m_p, cnt_p, w2_p, b2_p)


def _vmem_requirement(block_n, D, H_p, C_p, B_p, res_bufs):
    """Conservative VMEM bytes for the chosen geometry (actual buffer counts)."""
    return (
        2 * block_n * D * 2                      # x tiles (bf16, double-buffered)
        + 2 * B_p * block_n * 1                  # membership tiles (int8, double-buffered)
        + res_bufs * (D * H_p * 2                # W1
                      + H_p * 4                  # b1
                      + H_p * C_p * 2            # W2
                      + C_p * 4                  # b2
                      + B_p * 4)                 # counts
        + 2 * B_p * C_p * 4                      # output block
        + B_p * H_p * 4                          # f32 accumulator scratch
        + 2 * block_n * H_p * 4                  # f32 h intermediate + bf16 copy headroom
        + (4 << 20)                              # Mosaic internal scratch / misc headroom
    )


# ------------------------------- forward --------------------------------------

def bag_model_forward(x, ids, w1, b1, w2, b2, block_n=None):
    """JAX/Pallas equivalent of BagModel.forward."""
    x = jnp.asarray(x, jnp.float32)
    N, D = x.shape

    if ids is None:
        ids_np = np.zeros((1, N), dtype=np.int64)       # torch default: zeros
    else:
        ids_np = np.asarray(ids)
        if ids_np.ndim == 1:
            ids_np = ids_np.reshape(1, -1)              # torch: ids.resize_(1, len(ids))
    inner_ids = ids_np[-1]

    # ---- host-side bag bookkeeping (vectorized, single np.unique) -----------
    uniq, first_idx, inverse, counts = np.unique(
        inner_ids, return_index=True, return_inverse=True, return_counts=True)
    order = np.argsort(first_idx)                       # bags in first-occurrence order
    counts_ord = counts[order].astype(np.float32)
    B = uniq.shape[0]
    H = int(np.shape(w1)[1])
    C = int(np.shape(w2)[1])

    # ---- generation-aware geometry -------------------------------------------
    try:
        info = pltpu.get_tpu_info()
        vmem_cap = int(getattr(info, "vmem_capacity_bytes", 64 << 20))
    except Exception:
        vmem_cap = 64 << 20                             # conservative: OK on v5e/v6e/v7x

    B_p = _round_up(B, 32)                              # int8 membership: native (32,128) tiles
    H_p = _round_up(H, 128)                             # lane-dense hidden dim
    C_p = _round_up(C, 128)                             # lane-dense output stores

    n_cap = max(128, _round_up(N, 128))
    budget = int(0.70 * vmem_cap)
    if block_n is None:
        block_n = 128
        for cand in (8192, 4096, 2048, 1024, 512, 256, 128):
            cand = min(cand, n_cap)
            if _vmem_requirement(cand, D, H_p, C_p, B_p, res_bufs=1) <= budget:
                block_n = cand
                break
    else:
        block_n = min(max(128, _round_up(int(block_n), 128)), n_cap)
    N_p = _round_up(N, block_n)

    # ---- 0/1 membership, bag-major [B_p, N_p], int8 (halves HBM stream) -----
    rank = np.empty(B, dtype=np.int64)
    rank[order] = np.arange(B)                          # sorted-unique idx -> bag row
    bag_row = rank[inverse]                             # bag row per instance
    membership = np.zeros((B_p, N_p), dtype=np.int8)
    membership[bag_row, np.arange(N)] = 1               # padded instance cols stay 0

    counts_p = np.ones((B_p, 1), dtype=np.float32)      # padded bags: count 1 (rows sliced off)
    counts_p[:B, 0] = counts_ord

    # ---- pad + cast operands (bf16 MXU feeds, f32 bias/counts) ---------------
    x_p = jnp.zeros((N_p, D), jnp.bfloat16).at[:N, :].set(x.astype(jnp.bfloat16))
    w1_p = jnp.zeros((D, H_p), jnp.bfloat16).at[:, :H].set(jnp.asarray(w1, jnp.bfloat16))
    b1_p = jnp.zeros((1, H_p), jnp.float32).at[0, :H].set(jnp.asarray(b1, jnp.float32))
    w2_p = jnp.zeros((H_p, C_p), jnp.bfloat16).at[:H, :C].set(jnp.asarray(w2, jnp.bfloat16))
    b2_p = jnp.zeros((1, C_p), jnp.float32).at[0, :C].set(jnp.asarray(b2, jnp.float32))
    m_p = jnp.asarray(membership)                       # int8, bag-major
    cnt_p = jnp.asarray(counts_p)

    def _call(single_buffer):
        res_bufs = 1 if single_buffer else 2
        req = _vmem_requirement(block_n, D, H_p, C_p, B_p, res_bufs=res_bufs)
        hard_cap = max(32 << 20, vmem_cap - (8 << 20))
        vmem_limit = int(min(max(int(1.25 * req), 32 << 20), hard_cap))
        vmem_limit = max(vmem_limit, int(req))          # never under-declare
        return _bag_pallas(x_p, w1_p, b1_p, m_p, cnt_p, w2_p, b2_p,
                           block_n=block_n,
                           single_buffer_residents=single_buffer,
                           vmem_limit=vmem_limit)

    try:
        out_p = _call(True)
        out_p = jax.block_until_ready(out_p)
    except Exception:
        # pl.Buffered(1) on resident specs not supported here -> default buffering.
        out_p = _call(False)

    out = out_p[:B, :C]

    if ids_np.shape[0] == 1:
        return out
    # Multi-level ids path: (output, ids[:, mask]) with mask = cumsum of counts
    # in bag order - host-side glue mirroring the torch code verbatim.
    upper_ids = ids_np[:-1]
    csum = np.cumsum(counts_ord.astype(np.int64))
    mask = np.concatenate([[0], csum[:-1]])
    return out, jnp.asarray(upper_ids[:, mask])


# ------------------------------ references ------------------------------------

def _reference_forward_f32(x, ids, w1, b1, w2, b2):
    """Pure-f32 torch-semantics reference (sum-then-divide mean)."""
    x = jnp.asarray(x, jnp.float32)
    ids_np = np.asarray(ids)
    ids_np = ids_np.reshape(1, -1) if ids_np.ndim == 1 else ids_np
    inner_ids = ids_np[-1]
    uniq, first_idx = np.unique(inner_ids, return_index=True)
    bags = uniq[np.argsort(first_idx)]
    h = jnp.maximum(x @ jnp.asarray(w1, jnp.float32) + jnp.asarray(b1, jnp.float32), 0.0)
    rows = [jnp.mean(h[np.where(inner_ids == b)[0]], axis=0) for b in bags]
    agg = jnp.stack(rows, axis=0)
    return agg @ jnp.asarray(w2, jnp.float32) + jnp.asarray(b2, jnp.float32)


def _reference_forward_matched(x, ids, w1, b1, w2, b2):
    """Same arithmetic as the kernel (bf16 MXU operands, f32 accumulation)."""
    x = jnp.asarray(x, jnp.float32)
    ids_np = np.asarray(ids)
    ids_np = ids_np.reshape(1, -1) if ids_np.ndim == 1 else ids_np
    inner_ids = ids_np[-1]
    uniq, first_idx, inverse, counts = np.unique(
        inner_ids, return_index=True, return_inverse=True, return_counts=True)
    order = np.argsort(first_idx)
    B, N = len(uniq), len(inner_ids)
    rank = np.empty(B, dtype=np.int64)
    rank[order] = np.arange(B)
    bag_row = rank[inverse]
    m = np.zeros((B, N), dtype=np.float32)
    m[bag_row, np.arange(N)] = 1.0
    counts_ord = counts[order].astype(np.float32)

    h = jnp.dot(x.astype(jnp.bfloat16), jnp.asarray(w1, jnp.bfloat16),
                preferred_element_type=jnp.float32)
    h = jnp.maximum(h + jnp.asarray(b1, jnp.float32), 0.0).astype(jnp.bfloat16)
    agg = jnp.dot(jnp.asarray(m, jnp.bfloat16), h,
                  preferred_element_type=jnp.float32) / counts_ord[:, None]
    out = jnp.dot(agg.astype(jnp.bfloat16), jnp.asarray(w2, jnp.bfloat16),
                  preferred_element_type=jnp.float32) + jnp.asarray(b2, jnp.float32)
    return out


if __name__ == "__main__":
    # SMALL shapes: N=384 instances, D=16 features, H=32 hidden, C=4 classes, 6 bags.
    N, D, H, C, B = 384, 16, 32, 4, 6
    key = jax.random.PRNGKey(0)
    k_x, k_id, k_w1, k_b1, k_w2, k_b2 = jax.random.split(key, 6)

    x = jax.random.normal(k_x, (N, D), dtype=jnp.float32)
    # bag id per instance (interleaved, non-contiguous - exercises the grouping)
    ids = jax.random.randint(k_id, (N,), 0, B, dtype=jnp.int32)

    w1 = jax.random.normal(k_w1, (D, H), dtype=jnp.float32) * 0.1
    b1 = jax.random.normal(k_b1, (H,), dtype=jnp.float32) * 0.1
    w2 = jax.random.normal(k_w2, (H, C), dtype=jnp.float32) * 0.1
    b2 = jax.random.normal(k_b2, (C,), dtype=jnp.float32) * 0.1

    # Multi-tile path: block_n=128 -> 3 instance tiles (init / accumulate / finalize).
    out_tiled = bag_model_forward(x, ids, w1, b1, w2, b2, block_n=128)
    out_tiled = jax.block_until_ready(out_tiled)

    # Auto-geometry path (hardware-aware block_n -> single tile at this N).
    out_auto = bag_model_forward(x, ids, w1, b1, w2, b2)
    out_auto = jax.block_until_ready(out_auto)

    # Tight check against a reference with identical bf16/f32 arithmetic.
    ref_matched = _reference_forward_matched(x, ids, w1, b1, w2, b2)
    np.testing.assert_allclose(np.asarray(out_tiled), np.asarray(ref_matched),
                               rtol=1e-3, atol=1e-3)
    np.testing.assert_allclose(np.asarray(out_auto), np.asarray(ref_matched),
                               rtol=1e-3, atol=1e-3)
    # Loose check against the pure-f32 torch-semantics reference.
    ref_f32 = _reference_forward_f32(x, ids, w1, b1, w2, b2)
    np.testing.assert_allclose(np.asarray(out_tiled), np.asarray(ref_f32),
                               rtol=3e-2, atol=3e-2)

    print("KERNEL_OK")
</pallas_src>

<mosaic_0001>
module attributes {stable_mosaic.version = 11 : i64} {
  func.func @_bag_kernel(%arg0: i32, %arg1: memref<128x16xbf16, #tpu.memory_space<vmem>>, %arg2: memref<16x128xbf16, #tpu.memory_space<vmem>>, %arg3: memref<1x128xf32, #tpu.memory_space<vmem>>, %arg4: memref<32x128xi8, #tpu.memory_space<vmem>>, %arg5: memref<32x1xf32, #tpu.memory_space<vmem>>, %arg6: memref<128x128xbf16, #tpu.memory_space<vmem>>, %arg7: memref<1x128xf32, #tpu.memory_space<vmem>>, %arg8: memref<32x128xf32, #tpu.memory_space<vmem>>, %arg9: memref<32x128xf32, #tpu.memory_space<vmem>>) attributes {dimension_semantics = [#tpu.dimension_semantics<arbitrary>], iteration_bounds = array<i64: 3>, scalar_prefetch = 0 : i64, scratch_operands = 1 : i64, tpu.core_type = #tpu.core_type<tc>, window_params = [{transform_indices = @transform_0, window_bounds = array<i64: 128, 16>}, {pipeline_mode = #tpu.pipeline_mode<synchronous>, transform_indices = @transform_1, window_bounds = array<i64: 16, 128>}, {pipeline_mode = #tpu.pipeline_mode<synchronous>, transform_indices = @transform_2, window_bounds = array<i64: 1, 128>}, {transform_indices = @transform_3, window_bounds = array<i64: 32, 128>}, {pipeline_mode = #tpu.pipeline_mode<synchronous>, transform_indices = @transform_4, window_bounds = array<i64: 32, 1>}, {pipeline_mode = #tpu.pipeline_mode<synchronous>, transform_indices = @transform_5, window_bounds = array<i64: 128, 128>}, {pipeline_mode = #tpu.pipeline_mode<synchronous>, transform_indices = @transform_6, window_bounds = array<i64: 1, 128>}, {pipeline_mode = #tpu.pipeline_mode<synchronous>, transform_indices = @transform_7, window_bounds = array<i64: 32, 128>}]} {
    %c0_i32 = arith.constant 0 : i32
    %0 = arith.cmpi eq, %arg0, %c0_i32 : i32
    %1 = arith.extui %0 : i1 to i32
    %c0_i32_0 = arith.constant 0 : i32
    %2 = arith.cmpi ne, %1, %c0_i32_0 : i32
    scf.if %2 {
      %cst_15 = arith.constant 0.000000e+00 : f32
      %21 = vector.broadcast %cst_15 : f32 to vector<32x128xf32>
      %c0_16 = arith.constant 0 : index
      %c0_17 = arith.constant 0 : index
      %22 = vector.load %arg9[%c0_16, %c0_17] : memref<32x128xf32, #tpu.memory_space<vmem>>, vector<32x128xf32>
      tpu.vector_store %arg9[%c0_16, %c0_17], %21 {strides = array<i32>} : memref<32x128xf32, #tpu.memory_space<vmem>>, vector<32x128xf32>,
    } else {
    }
    %c0 = arith.constant 0 : index
    %c0_1 = arith.constant 0 : index
    %3 = vector.load %arg1[%c0, %c0_1] : memref<128x16xbf16, #tpu.memory_space<vmem>>, vector<128x16xbf16>
    %c0_2 = arith.constant 0 : index
    %c0_3 = arith.constant 0 : index
    %4 = vector.load %arg2[%c0_2, %c0_3] : memref<16x128xbf16, #tpu.memory_space<vmem>>, vector<16x128xbf16>
    %cst = arith.constant dense<0.000000e+00> : vector<128x128xf32>
    %5 = tpu.matmul %3, %4, %cst {dimension_numbers = #tpu.dot_dimension_numbers<[1], [0], [0], [1], [0, 0, 1, 1], [], []>} : vector<128x16xbf16>, vector<16x128xbf16>, vector<128x128xf32> -> vector<128x128xf32>
    %c0_4 = arith.constant 0 : index
    %c0_5 = arith.constant 0 : index
    %6 = vector.load %arg3[%c0_4, %c0_5] : memref<1x128xf32, #tpu.memory_space<vmem>>, vector<1x128xf32>
    %7 = vector.broadcast %6 : vector<1x128xf32> to vector<128x128xf32>
    %8 = arith.addf %5, %7 : vector<128x128xf32>
    %cst_6 = arith.constant 0.000000e+00 : f32
    %9 = vector.broadcast %cst_6 : f32 to vector<128x128xf32>
    %10 = arith.maximumf %8, %9 : vector<128x128xf32>
    %c0_7 = arith.constant 0 : index
    %c0_8 = arith.constant 0 : index
    %11 = vector.load %arg4[%c0_7, %c0_8] : memref<32x128xi8, #tpu.memory_space<vmem>>, vector<32x128xi8>
    %12 = arith.sitofp %11 : vector<32x128xi8> to vector<32x128xbf16>
    %c0_9 = arith.constant 0 : index
    %c0_10 = arith.constant 0 : index
    %13 = vector.load %arg9[%c0_9, %c0_10] : memref<32x128xf32, #tpu.memory_space<vmem>>, vector<32x128xf32>
    %14 = arith.truncf %10 : vector<128x128xf32> to vector<128x128xbf16>
    %cst_11 = arith.constant dense<0.000000e+00> : vector<32x128xf32>
    %15 = tpu.matmul %12, %14, %cst_11 {dimension_numbers = #tpu.dot_dimension_numbers<[1], [0], [0], [1], [0, 0, 1, 1], [], []>} : vector<32x128xbf16>, vector<128x128xbf16>, vector<32x128xf32> -> vector<32x128xf32>
    %16 = arith.addf %13, %15 : vector<32x128xf32>
    %c0_12 = arith.constant 0 : index
    %c0_13 = arith.constant 0 : index
    %17 = vector.load %arg9[%c0_12, %c0_13] : memref<32x128xf32, #tpu.memory_space<vmem>>, vector<32x128xf32>
    tpu.vector_store %arg9[%c0_12, %c0_13], %16 {strides = array<i32>} : memref<32x128xf32, #tpu.memory_space<vmem>>, vector<32x128xf32>,
    %c2_i32 = arith.constant 2 : i32
    %18 = arith.cmpi eq, %arg0, %c2_i32 : i32
    %19 = arith.extui %18 : i1 to i32
    %c0_i32_14 = arith.constant 0 : i32
    %20 = arith.cmpi ne, %19, %c0_i32_14 : i32
    scf.if %20 {
      %c0_15 = arith.constant 0 : index
      %c0_16 = arith.constant 0 : index
      %21 = vector.load %arg9[%c0_15, %c0_16] : memref<32x128xf32, #tpu.memory_space<vmem>>, vector<32x128xf32>
      %c0_17 = arith.constant 0 : index
      %c0_18 = arith.constant 0 : index
      %22 = vector.load %arg5[%c0_17, %c0_18] : memref<32x1xf32, #tpu.memory_space<vmem>>, vector<32x1xf32>
      %23 = vector.broadcast %22 : vector<32x1xf32> to vector<32x128xf32>
      %24 = arith.divf %21, %23 : vector<32x128xf32>
      %25 = arith.truncf %24 : vector<32x128xf32> to vector<32x128xbf16>
      %c0_19 = arith.constant 0 : index
      %c0_20 = arith.constant 0 : index
      %26 = vector.load %arg6[%c0_19, %c0_20] : memref<128x128xbf16, #tpu.memory_space<vmem>>, vector<128x128xbf16>
      %cst_21 = arith.constant dense<0.000000e+00> : vector<32x128xf32>
      %27 = tpu.matmul %25, %26, %cst_21 {dimension_numbers = #tpu.dot_dimension_numbers<[1], [0], [0], [1], [0, 0, 1, 1], [], []>} : vector<32x128xbf16>, vector<128x128xbf16>, vector<32x128xf32> -> vector<32x128xf32>
      %c0_22 = arith.constant 0 : index
      %c0_23 = arith.constant 0 : index
      %28 = vector.load %arg7[%c0_22, %c0_23] : memref<1x128xf32, #tpu.memory_space<vmem>>, vector<1x128xf32>
      %29 = vector.broadcast %28 : vector<1x128xf32> to vector<32x128xf32>
      %30 = arith.addf %27, %29 : vector<32x128xf32>
      %c0_24 = arith.constant 0 : index
      %c0_25 = arith.constant 0 : index
      %31 = vector.load %arg8[%c0_24, %c0_25] : memref<32x128xf32, #tpu.memory_space<vmem>>, vector<32x128xf32>
      tpu.vector_store %arg8[%c0_24, %c0_25], %30 {strides = array<i32>} : memref<32x128xf32, #tpu.memory_space<vmem>>, vector<32x128xf32>,
    } else {
    }
    return
  }
  func.func @transform_0(%arg0: i32) -> (i32, i32) {
    %c0_i32 = arith.constant 0 : i32
    %c0_i32_0 = arith.constant 0 : i32
    return %arg0, %c0_i32 : i32, i32
  }
  func.func @transform_1(%arg0: i32) -> (i32, i32) {
    %c0_i32 = arith.constant 0 : i32
    %c0_i32_0 = arith.constant 0 : i32
    %c0_i32_1 = arith.constant 0 : i32
    return %c0_i32, %c0_i32_0 : i32, i32
  }
  func.func @transform_2(%arg0: i32) -> (i32, i32) {
    %c0_i32 = arith.constant 0 : i32
    %c0_i32_0 = arith.constant 0 : i32
    %c0_i32_1 = arith.constant 0 : i32
    return %c0_i32, %c0_i32_0 : i32, i32
  }
  func.func @transform_3(%arg0: i32) -> (i32, i32) {
    %c0_i32 = arith.constant 0 : i32
    %c0_i32_0 = arith.constant 0 : i32
    return %c0_i32, %arg0 : i32, i32
  }
  func.func @transform_4(%arg0: i32) -> (i32, i32) {
    %c0_i32 = arith.constant 0 : i32
    %c0_i32_0 = arith.constant 0 : i32
    %c0_i32_1 = arith.constant 0 : i32
    return %c0_i32, %c0_i32_0 : i32, i32
  }
  func.func @transform_5(%arg0: i32) -> (i32, i32) {
    %c0_i32 = arith.constant 0 : i32
    %c0_i32_0 = arith.constant 0 : i32
    %c0_i32_1 = arith.constant 0 : i32
    return %c0_i32, %c0_i32_0 : i32, i32
  }
  func.func @transform_6(%arg0: i32) -> (i32, i32) {
    %c0_i32 = arith.constant 0 : i32
    %c0_i32_0 = arith.constant 0 : i32
    %c0_i32_1 = arith.constant 0 : i32
    return %c0_i32, %c0_i32_0 : i32, i32
  }
  func.func @transform_7(%arg0: i32) -> (i32, i32) {
    %c0_i32 = arith.constant 0 : i32
    %c0_i32_0 = arith.constant 0 : i32
    %c0_i32_1 = arith.constant 0 : i32
    return %c0_i32, %c0_i32_0 : i32, i32
  }
}

module attributes {stable_mosaic.version = 11 : i64} {
  func.func @_bag_kernel(%arg0: i32, %arg1: memref<128x16xbf16, #tpu.memory_space<vmem>>, %arg2: memref<16x128xbf16, #tpu.memory_space<vmem>>, %arg3: memref<1x128xf32, #tpu.memory_space<vmem>>, %arg4: memref<32x128xi8, #tpu.memory_space<vmem>>, %arg5: memref<32x1xf32, #tpu.memory_space<vmem>>, %arg6: memref<128x128xbf16, #tpu.memory_space<vmem>>, %arg7: memref<1x128xf32, #tpu.memory_space<vmem>>, %arg8: memref<32x128xf32, #tpu.memory_space<vmem>>, %arg9: memref<32x128xf32, #tpu.memory_space<vmem>>) attributes {dimension_semantics = [#tpu.dimension_semantics<arbitrary>], iteration_bounds = array<i64: 3>, scalar_prefetch = 0 : i64, scratch_operands = 1 : i64, tpu.core_type = #tpu.core_type<tc>, window_params = [{transform_indices = @transform_0, window_bounds = array<i64: 128, 16>}, {pipeline_mode = #tpu.pipeline_mode<synchronous>, transform_indices = @transform_1, window_bounds = array<i64: 16, 128>}, {pipeline_mode = #tpu.pipeline_mode<synchronous>, transform_indices = @transform_2, window_bounds = array<i64: 1, 128>}, {transform_indices = @transform_3, window_bounds = array<i64: 32, 128>}, {pipeline_mode = #tpu.pipeline_mode<synchronous>, transform_indices = @transform_4, window_bounds = array<i64: 32, 1>}, {pipeline_mode = #tpu.pipeline_mode<synchronous>, transform_indices = @transform_5, window_bounds = array<i64: 128, 128>}, {pipeline_mode = #tpu.pipeline_mode<synchronous>, transform_indices = @transform_6, window_bounds = array<i64: 1, 128>}, {pipeline_mode = #tpu.pipeline_mode<synchronous>, transform_indices = @transform_7, window_bounds = array<i64: 32, 128>}]} {
    %c0_i32 = arith.constant 0 : i32
    %0 = arith.cmpi eq, %arg0, %c0_i32 : i32
    %1 = arith.extui %0 : i1 to i32
    %c0_i32_0 = arith.constant 0 : i32
    %2 = arith.cmpi ne, %1, %c0_i32_0 : i32
    scf.if %2 {
      %cst_15 = arith.constant 0.000000e+00 : f32
      %21 = vector.broadcast %cst_15 : f32 to vector<32x128xf32>
      %c0_16 = arith.constant 0 : index
      %c0_17 = arith.constant 0 : index
      %22 = vector.load %arg9[%c0_16, %c0_17] : memref<32x128xf32, #tpu.memory_space<vmem>>, vector<32x128xf32>
      tpu.vector_store %arg9[%c0_16, %c0_17], %21 {strides = array<i32>} : memref<32x128xf32, #tpu.memory_space<vmem>>, vector<32x128xf32>,
    } else {
    }
    %c0 = arith.constant 0 : index
    %c0_1 = arith.constant 0 : index
    %3 = vector.load %arg1[%c0, %c0_1] : memref<128x16xbf16, #tpu.memory_space<vmem>>, vector<128x16xbf16>
    %c0_2 = arith.constant 0 : index
    %c0_3 = arith.constant 0 : index
    %4 = vector.load %arg2[%c0_2, %c0_3] : memref<16x128xbf16, #tpu.memory_space<vmem>>, vector<16x128xbf16>
    %cst = arith.constant dense<0.000000e+00> : vector<128x128xf32>
    %5 = tpu.matmul %3, %4, %cst {dimension_numbers = #tpu.dot_dimension_numbers<[1], [0], [0], [1], [0, 0, 1, 1], [], []>} : vector<128x16xbf16>, vector<16x128xbf16>, vector<128x128xf32> -> vector<128x128xf32>
    %c0_4 = arith.constant 0 : index
    %c0_5 = arith.constant 0 : index
    %6 = vector.load %arg3[%c0_4, %c0_5] : memref<1x128xf32, #tpu.memory_space<vmem>>, vector<1x128xf32>
    %7 = vector.broadcast %6 : vector<1x128xf32> to vector<128x128xf32>
    %8 = arith.addf %5, %7 : vector<128x128xf32>
    %cst_6 = arith.constant 0.000000e+00 : f32
    %9 = vector.broadcast %cst_6 : f32 to vector<128x128xf32>
    %10 = arith.maximumf %8, %9 : vector<128x128xf32>
    %c0_7 = arith.constant 0 : index
    %c0_8 = arith.constant 0 : index
    %11 = vector.load %arg4[%c0_7, %c0_8] : memref<32x128xi8, #tpu.memory_space<vmem>>, vector<32x128xi8>
    %12 = arith.sitofp %11 : vector<32x128xi8> to vector<32x128xbf16>
    %c0_9 = arith.constant 0 : index
    %c0_10 = arith.constant 0 : index
    %13 = vector.load %arg9[%c0_9, %c0_10] : memref<32x128xf32, #tpu.memory_space<vmem>>, vector<32x128xf32>
    %14 = arith.truncf %10 : vector<128x128xf32> to vector<128x128xbf16>
    %cst_11 = arith.constant dense<0.000000e+00> : vector<32x128xf32>
    %15 = tpu.matmul %12, %14, %cst_11 {dimension_numbers = #tpu.dot_dimension_numbers<[1], [0], [0], [1], [0, 0, 1, 1], [], []>} : vector<32x128xbf16>, vector<128x128xbf16>, vector<32x128xf32> -> vector<32x128xf32>
    %16 = arith.addf %13, %15 : vector<32x128xf32>
    %c0_12 = arith.constant 0 : index
    %c0_13 = arith.constant 0 : index
    %17 = vector.load %arg9[%c0_12, %c0_13] : memref<32x128xf32, #tpu.memory_space<vmem>>, vector<32x128xf32>
    tpu.vector_store %arg9[%c0_12, %c0_13], %16 {strides = array<i32>} : memref<32x128xf32, #tpu.memory_space<vmem>>, vector<32x128xf32>,
    %c2_i32 = arith.constant 2 : i32
    %18 = arith.cmpi eq, %arg0, %c2_i32 : i32
    %19 = arith.extui %18 : i1 to i32
    %c0_i32_14 = arith.constant 0 : i32
    %20 = arith.cmpi ne, %19, %c0_i32_14 : i32
    scf.if %20 {
      %c0_15 = arith.constant 0 : index
      %c0_16 = arith.constant 0 : index
      %21 = vector.load %arg9[%c0_15, %c0_16] : memref<32x128xf32, #tpu.memory_space<vmem>>, vector<32x128xf32>
      %c0_17 = arith.constant 0 : index
      %c0_18 = arith.constant 0 : index
      %22 = vector.load %arg5[%c0_17, %c0_18] : memref<32x1xf32, #tpu.memory_space<vmem>>, vector<32x1xf32>
      %23 = vector.broadcast %22 : vector<32x1xf32> to vector<32x128xf32>
      %24 = arith.divf %21, %23 : vector<32x128xf32>
      %25 = arith.truncf %24 : vector<32x128xf32> to vector<32x128xbf16>
      %c0_19 = arith.constant 0 : index
      %c0_20 = arith.constant 0 : index
      %26 = vector.load %arg6[%c0_19, %c0_20] : memref<128x128xbf16, #tpu.memory_space<vmem>>, vector<128x128xbf16>
      %cst_21 = arith.constant dense<0.000000e+00> : vector<32x128xf32>
      %27 = tpu.matmul %25, %26, %cst_21 {dimension_numbers = #tpu.dot_dimension_numbers<[1], [0], [0], [1], [0, 0, 1, 1], [], []>} : vector<32x128xbf16>, vector<128x128xbf16>, vector<32x128xf32> -> vector<32x128xf32>
      %c0_22 = arith.constant 0 : index
      %c0_23 = arith.constant 0 : index
      %28 = vector.load %arg7[%c0_22, %c0_23] : memref<1x128xf32, #tpu.memory_space<vmem>>, vector<1x128xf32>
      %29 = vector.broadcast %28 : vector<1x128xf32> to vector<32x128xf32>
      %30 = arith.addf %27, %29 : vector<32x128xf32>
      %c0_24 = arith.constant 0 : index
      %c0_25 = arith.constant 0 : index
      %31 = vector.load %arg8[%c0_24, %c0_25] : memref<32x128xf32, #tpu.memory_space<vmem>>, vector<32x128xf32>
      tpu.vector_store %arg8[%c0_24, %c0_25], %30 {strides = array<i32>} : memref<32x128xf32, #tpu.memory_space<vmem>>, vector<32x128xf32>,
    } else {
    }
    return
  }
  func.func @transform_0(%arg0: i32) -> (i32, i32) {
    %c0_i32 = arith.constant 0 : i32
    %c0_i32_0 = arith.constant 0 : i32
    return %arg0, %c0_i32 : i32, i32
  }
  func.func @transform_1(%arg0: i32) -> (i32, i32) {
    %c0_i32 = arith.constant 0 : i32
    %c0_i32_0 = arith.constant 0 : i32
    %c0_i32_1 = arith.constant 0 : i32
    return %c0_i32, %c0_i32_0 : i32, i32
  }
  func.func @transform_2(%arg0: i32) -> (i32, i32) {
    %c0_i32 = arith.constant 0 : i32
    %c0_i32_0 = arith.constant 0 : i32
    %c0_i32_1 = arith.constant 0 : i32
    return %c0_i32, %c0_i32_0 : i32, i32
  }
  func.func @transform_3(%arg0: i32) -> (i32, i32) {
    %c0_i32 = arith.constant 0 : i32
    %c0_i32_0 = arith.constant 0 : i32
    return %c0_i32, %arg0 : i32, i32
  }
  func.func @transform_4(%arg0: i32) -> (i32, i32) {
    %c0_i32 = arith.constant 0 : i32
    %c0_i32_0 = arith.constant 0 : i32
    %c0_i32_1 = arith.constant 0 : i32
    return %c0_i32, %c0_i32_0 : i32, i32
  }
  func.func @transform_5(%arg0: i32) -> (i32, i32) {
    %c0_i32 = arith.constant 0 : i32
    %c0_i32_0 = arith.constant 0 : i32
    %c0_i32_1 = arith.constant 0 : i32
    return %c0_i32, %c0_i32_0 : i32, i32
  }
  func.func @transform_6(%arg0: i32) -> (i32, i32) {
    %c0_i32 = arith.constant 0 : i32
    %c0_i32_0 = arith.constant 0 : i32
    %c0_i32_1 = arith.constant 0 : i32
    return %c0_i32, %c0_i32_0 : i32, i32
  }
  func.func @transform_7(%arg0: i32) -> (i32, i32) {
    %c0_i32 = arith.constant 0 : i32
    %c0_i32_0 = arith.constant 0 : i32
    %c0_i32_1 = arith.constant 0 : i32
    return %c0_i32, %c0_i32_0 : i32, i32
  }
}

</mosaic_0001>

<bundles_post_ra>
// kernel: _bag_pallas.1
= control target key start
LH: loop header
LB: loop body
LE: loop exit
PB: predicated region body
PF: predicated region fallthrough
CT: control target
= control target key end

     0   :  { %12 = vsyncpa [#allocation4], 0  ;;  %s1056_s24 = smov 0   ;;  %s1160_s0 = inlined_call_operand.vmem [shape: bf16[384,16], index: 0, kind: input, shape index: {}]   ;;  %s1161_s1 = inlined_call_operand.vmem [shape: bf16[16,128], index: 1, kind: input, shape index: {}]   ;;  %s1162_s2 = inlined_call_operand.vmem [shape: f32[1,128], index: 2, kind: input, shape index: {}]   ;;  %s1163_s3 = inlined_call_operand.vmem [shape: s8[32,384], index: 3, kind: input, shape index: {}]   ;;  %s1164_s4 = inlined_call_operand.vmem [shape: f32[32,1], index: 4, kind: input, shape index: {}]   ;;  %s1165_s5 = inlined_call_operand.vmem [shape: bf16[128,128], index: 5, kind: input, shape index: {}]   ;;  %s1166_s6 = inlined_call_operand.vmem [shape: f32[1,128], index: 6, kind: input, shape index: {}]   ;;  %s1167_s7 = inlined_call_operand.hbm [shape: f32[32,128], index: 7, kind: output, shape index: {}]  }
   0x1 LB: > { %s1062_s25 = sadd.s32 4294967295, %s1009_s24   ;;  %p803_p0 = scmp.ge.s32.totalorder %s1009_s24, 1  ;;  %s1009_s24 = sphi %s1056_s24, %s18_s24  }
   0x2   : > { %p243_p1 = scmp.lt.s32.totalorder %s1009_s24, 4 }
   0x4   : > { %p244_p2 = pnand %p803_p0, %p243_p1 }
   0x5   : > { %s804_s26 = sshll.u32 (!%p244_p2), %s1062_s25, 4  ;;  %p280_p3 = scmp.lt.s32.totalorder (!%p244_p2), %s1062_s25, 2 }
   0x6   : > { %247 = sbr.rel (%p244_p2) target bundleno = 753 (0x2f1), region = 48  ;;  %p275_p4 = scmp.lt.s32.totalorder (!%p244_p2), %s804_s26, 47 }
   0x7   : > { %p807_p5 = scmp.ne.s32.totalorder (!%p244_p2), %s1062_s25, 0 }
   0xd   : > { %s281_s27 = scalar_select %p280_p3, %s1062_s25, 2 }
   0xe   : > { %s1169_s26 = smov (!%p275_p4, %s804_s26), 47  ;;  %288 = sbr.rel (%p807_p5) target bundleno = 21 (0x15), region = 52 }
   0xf   : > { %s806_s28 = sshll.u32 %s281_s27, 3  ;;  %s805_s29 = sshll.u32 %s1169_s26, 2  ;;  %v1011_v0 = vmov (!%p807_p5), 0.0  }
  0x10   : > { %s283_s9 = scalar_lea.vmem %s1163_s3, %s806_s28  ;;  %s278_s12 = scalar_lea.vmem %s1160_s0, %s805_s29  ;;  %289 = vst [vmem:[#allocation2] sm:$0xff] (!%p807_p5), %v1011_v0  ;;  %290 = vst [vmem:[#allocation2 + $0x8] sm:$0xff] (!%p807_p5), %v1011_v0 }
  0x11   : > { %291 = vst [vmem:[#allocation2 + $0x10] sm:$0xff] (!%p807_p5), %v1011_v0  ;;  %292 = vst [vmem:[#allocation2 + $0x18] sm:$0xff] (!%p807_p5), %v1011_v0 }
  0x15 PF: > { %v946_v1 = vld [vmem:[%s1161_s1] sm:$0xff]   ;;  %vm364_vm0 = vcmask 130048   ;;  %v948_v3 = vld [vmem:[%s278_s12 + $0x8] sm:$0xff]   ;;  %v949_v4 = vld [vmem:[%s278_s12 + $0x10] sm:$0xff]   ;;  %p826_p6 = scmp.ne.s32.totalorder %s1062_s25, 2 }
  0x16   : > { %v947_v2 = vld [vmem:[%s278_s12] sm:$0xff]   ;;  %869 = vmatprep.subr.bf16.mxu0 %v946_v1  ;;  %v950_v5 = vld [vmem:[%s278_s12 + $0x18] sm:$0xff]   ;;  %v952_v7 = vld [vmem:[%s278_s12 + $0x28] sm:$0xff]  }
  0x17   : > { %870 = vmatpush3.bf16.msra.mxu0 %v946_v1  ;;  %871 = vmatprep.mubr.msk.bf16.mxu0 %vm364_vm0, %v947_v2  ;;  %v951_v6 = vld [vmem:[%s278_s12 + $0x20] sm:$0xff]   ;;  %v953_v8 = vld [vmem:[%s278_s12 + $0x30] sm:$0xff]   ;;  %v954_v9 = vld [vmem:[%s278_s12 + $0x38] sm:$0xff]  }
  0x18   : > { %v1087_v10 = vld [vmem:[%s283_s9] sm:$0xff] }
  0x19   : > { %v503_v11 = vunpack.c.l.s8.bf16 %v1087_v10  ;;  %v808_v12 = vld [vmem:[%s1162_s2] ss:$0 sm:$0xff] }
  0x1a   : > { %872 = vmatmul.mubr.msk.bf16.vlgmr.msra.gmra.mrb[0].mxu0 %vm364_vm0, %v948_v3 }
  0x1b   : > { %875 = vmatprep.mubr.msk.bf16.mxu0 %vm364_vm0, %v949_v4  ;;  %903 = vmatprep.mubr.bf16.mxu1 %v503_v11 }
  0x22   : > { %876 = vmatmul.mubr.msk.bf16.gmra.mrb[4].mxu0 %vm364_vm0, %v950_v5  ;;  %v504_v5 = vunpack.c.h.s8.bf16 %v1087_v10  ;;  %v584_v10 = vld [vmem:[%s1164_s4 + $0x10] sm:$0xff] (!%p826_p6) }
  0x23   : > { %879 = vmatprep.mubr.msk.bf16.mxu0 %vm364_vm0, %v951_v6  ;;  %v507_v6 = vld [vmem:[#allocation2 + $0x10] sm:$0xff] }
  0x2a   : > { %880 = vmatmul.mubr.msk.bf16.gmra.mrb[8].mxu0 %vm364_vm0, %v952_v7  ;;  %v505_v7 = vld [vmem:[#allocation2] sm:$0xff] }
  0x2b   : > { %883 = vmatprep.mubr.msk.bf16.mxu0 %vm364_vm0, %v953_v8 }
  0x32   : > { %884 = vmatmul.mubr.msk.bf16.gmra.mrb[12].mxu0 %vm364_vm0, %v954_v9  ;;  %v508_v9 = vld [vmem:[#allocation2 + $0x18] sm:$0xff] }
  0xed   : > { %v873_v13 = vpop.f32.mrb[0].mxu0 }
  0xee   : > { %v432_v14 = vadd.f32 %v873_v13, %v808_v12  ;;  %v423_v15 = vpop.f32.mrb[1].mxu0  ;;  %v506_v13 = vld [vmem:[#allocation2 + $0x8] sm:$0xff] }
  0xef   : > { %v424_v16 = vadd.f32 %v808_v12, %v423_v15  ;;  %v874_v17 = vpop.f32.mrb[2].mxu0 }
  0xf0   : > { %v435_v18 = vadd.f32 %v874_v17, %v808_v12  ;;  %v426_v19 = vpop.f32.mrb[3].mxu0  ;;  %v488_v21 = vmax.f32 %v432_v14, 0.0 }
  0xf1   : > { %v427_v20 = vadd.f32 %v808_v12, %v426_v19  ;;  %v486_v23 = vmax.f32 %v424_v16, 0.0  ;;  %v582_v19 = vld [vmem:[%s1164_s4] sm:$0xff] (!%p826_p6) }
  0xf2   : > { %v489_v22 = vmax.f32 %v435_v18, 0.0 }
  0xf3   : > { %v487_v24 = vmax.f32 %v427_v20, 0.0  ;;  %v1012_v20 = vmov (!%p826_p6), 0  }
  0xf4   : > { %v510_v25 = vpack.c.bf16 %v489_v22, %v488_v21  ;;  %956 = vset.pattern.permute.xlu1 (!%p826_p6), %v1012_v20  ;;  %955 = vset.pattern.permute.xlu0 (!%p826_p6), %v1012_v20  ;;  %v585_v21 = vld [vmem:[%s1164_s4 + $0x18] sm:$0xff] (!%p826_p6)  ;;  %v583_v22 = vld [vmem:[%s1164_s4 + $0x8] sm:$0xff] (!%p826_p6) }
  0xf5   : > { %v877_v26 = vpop.f32.mrb[4].mxu0  ;;  %v509_v27 = vpack.c.bf16 %v487_v24, %v486_v23  ;;  %598 = vperm.xlu1 (!%p826_p6), %956, %v584_v10   ;;  %588 = vperm.xlu0 (!%p826_p6), %955, %v582_v19   ;;  %v957_v23 = vld [vmem:[%s1165_s5] sm:$0xff] (!%p826_p6)   ;;  %v958_v24 = vld [vmem:[%s1165_s5 + $0x8] sm:$0xff] (!%p826_p6)  }
  0xf6   : > { %v448_v28 = vadd.f32 %v877_v26, %v808_v12  ;;  %v439_v29 = vpop.f32.mrb[5].mxu0  ;;  %907 = vmatprep.subr.bf16.mxu0 (!%p826_p6), %v957_v23  ;;  %v960_v26 = vld [vmem:[%s1165_s5 + $0x18] sm:$0xff] (!%p826_p6)  }
  0xf7   : > { %v440_v30 = vadd.f32 %v808_v12, %v439_v29  ;;  %v878_v31 = vpop.f32.mrb[6].mxu0  ;;  %887 = vmatprep.subr.bf16.mxu1 %v509_v27  ;;  %908 = vmatpush3.bf16.msra.mxu0 (!%p826_p6), %v957_v23  ;;  %v963_v29 = vld [vmem:[%s1165_s5 + $0x30] sm:$0xff] (!%p826_p6)  }
  0xf8   : > { %v451_v32 = vadd.f32 %v878_v31, %v808_v12  ;;  %v442_v33 = vpop.f32.mrb[7].mxu0  ;;  %888 = vmatpush3.bf16.msra.mxu1 %v509_v27  ;;  %v492_v35 = vmax.f32 %v448_v28, 0.0  ;;  %909 = vmatprep.subr.bf16.mxu0 (!%p826_p6), %v958_v24  ;;  %v961_v27 = vld [vmem:[%s1165_s5 + $0x20] sm:$0xff] (!%p826_p6)   ;;  %v962_v28 = vld [vmem:[%s1165_s5 + $0x28] sm:$0xff] (!%p826_p6)  }
  0xf9   : > { %v443_v34 = vadd.f32 %v808_v12, %v442_v33  ;;  %889 = vmatprep.subr.bf16.mxu1 %v510_v25  ;;  %v490_v37 = vmax.f32 %v440_v30, 0.0  ;;  %603 = vperm.xlu1 (!%p826_p6), %956, %v585_v21   ;;  %v964_v30 = vld [vmem:[%s1165_s5 + $0x38] sm:$0xff] (!%p826_p6)  }
  0xfa   : > { %v493_v36 = vmax.f32 %v451_v32, 0.0  ;;  %593 = vperm.xlu0 (!%p826_p6), %955, %v583_v22  }
  0xfb   : > { %v491_v38 = vmax.f32 %v443_v34, 0.0  ;;  %910 = vmatpush3.bf16.msra.mxu0 (!%p826_p6), %v958_v24 }
  0xfc   : > { %v512_v39 = vpack.c.bf16 %v493_v36, %v492_v35  ;;  %890 = vmatpush3.bf16.msra.mxu1 %v510_v25  ;;  %v959_v25 = vld [vmem:[%s1165_s5 + $0x10] sm:$0xff] (!%p826_p6)  }
  0xfd   : > { %v511_v40 = vpack.c.bf16 %v491_v38, %v490_v37  ;;  %v881_v41 = vpop.f32.mrb[8].mxu0  ;;  %911 = vmatprep.subr.bf16.mxu0 (!%p826_p6), %v959_v25 }
  0xfe   : > { %v464_v42 = vadd.f32 %v881_v41, %v808_v12  ;;  %v455_v43 = vpop.f32.mrb[9].mxu0 }
  0xff   : > { %v456_v44 = vadd.f32 %v808_v12, %v455_v43  ;;  %v882_v45 = vpop.f32.mrb[10].mxu0  ;;  %891 = vmatprep.subr.bf16.mxu1 %v511_v40  ;;  %912 = vmatpush3.bf16.msra.mxu0 (!%p826_p6), %v959_v25 }
 0x100   : > { %v467_v46 = vadd.f32 %v882_v45, %v808_v12  ;;  %v458_v47 = vpop.f32.mrb[11].mxu0  ;;  %892 = vmatpush3.bf16.msra.mxu1 %v511_v40  ;;  %v496_v49 = vmax.f32 %v464_v42, 0.0  ;;  %913 = vmatprep.subr.bf16.mxu0 (!%p826_p6), %v960_v26 }
 0x101   : > { %v459_v48 = vadd.f32 %v808_v12, %v458_v47  ;;  %893 = vmatprep.subr.bf16.mxu1 %v512_v39  ;;  %v494_v51 = vmax.f32 %v456_v44, 0.0 }
 0x102   : > { %v497_v50 = vmax.f32 %v467_v46, 0.0 }
 0x103   : > { %v495_v52 = vmax.f32 %v459_v48, 0.0  ;;  %914 = vmatpush3.bf16.msra.mxu0 (!%p826_p6), %v960_v26 }
 0x104   : > { %v514_v53 = vpack.c.bf16 %v497_v50, %v496_v49  ;;  %894 = vmatpush3.bf16.msra.mxu1 %v512_v39  ;;  %915 = vmatprep.subr.bf16.mxu0 (!%p826_p6), %v961_v27  ;;  %v827_v49 = vld [vmem:[%s1166_s6] ss:$0 sm:$0xff] (!%p826_p6) }
 0x105   : > { %v513_v54 = vpack.c.bf16 %v495_v52, %v494_v51  ;;  %v885_v55 = vpop.f32.mrb[12].mxu0 }
 0x106   : > { %v480_v56 = vadd.f32 %v885_v55, %v808_v12  ;;  %v471_v57 = vpop.f32.mrb[13].mxu0 }
 0x107   : > { %v472_v58 = vadd.f32 %v808_v12, %v471_v57  ;;  %v886_v59 = vpop.f32.mrb[14].mxu0  ;;  %895 = vmatprep.subr.bf16.mxu1 %v513_v54  ;;  %916 = vmatpush3.bf16.msra.mxu0 (!%p826_p6), %v961_v27 }
 0x108   : > { %v483_v60 = vadd.f32 %v886_v59, %v808_v12  ;;  %v474_v61 = vpop.f32.mrb[15].mxu0  ;;  %896 = vmatpush3.bf16.msra.mxu1 %v513_v54  ;;  %v500_v63 = vmax.f32 %v480_v56, 0.0  ;;  %917 = vmatprep.subr.bf16.mxu0 (!%p826_p6), %v962_v28 }
 0x109   : > { %v475_v62 = vadd.f32 %v808_v12, %v474_v61  ;;  %897 = vmatprep.subr.bf16.mxu1 %v514_v53  ;;  %v498_v1 = vmax.f32 %v472_v58, 0.0 }
 0x10a   : > { %v501_v0 = vmax.f32 %v483_v60, 0.0 }
 0x10b   : > { %v499_v2 = vmax.f32 %v475_v62, 0.0  ;;  %918 = vmatpush3.bf16.msra.mxu0 (!%p826_p6), %v962_v28 }
 0x10c   : > { %v516_v3 = vpack.c.bf16 %v501_v0, %v500_v63  ;;  %898 = vmatpush3.bf16.msra.mxu1 %v514_v53  ;;  %919 = vmatprep.subr.bf16.mxu0 (!%p826_p6), %v963_v29 }
 0x10d   : > { %v515_v4 = vpack.c.bf16 %v499_v2, %v498_v1 }
 0x10f   : > { %899 = vmatprep.subr.bf16.mxu1 %v515_v4  ;;  %920 = vmatpush3.bf16.msra.mxu0 (!%p826_p6), %v963_v29 }
 0x110   : > { %900 = vmatpush3.bf16.msra.mxu1 %v515_v4  ;;  %921 = vmatprep.subr.bf16.mxu0 (!%p826_p6), %v964_v30 }
 0x111   : > { %901 = vmatprep.subr.bf16.mxu1 %v516_v3 }
 0x113   : > { %922 = vmatpush3.bf16.msra.mxu0 (!%p826_p6), %v964_v30 }
 0x114   : > { %902 = vmatpush3.bf16.msra.mxu1 %v516_v3 }
 0x117   : > { %904 = vmatmul.mubr.bf16.vlgmr.msra.gmra.mrb[0].mxu1 %v504_v5 }
 0x174   : > { %v599_v31 = vpop.permute.xlu1 (!%p826_p6), %598  ;;  %v589_v32 = vpop.permute.xlu0 (!%p826_p6), %588 }
 0x175   : > { %965 = vrcp.f32 (!%p826_p6), %v599_v31 }
 0x176   : > { %967 = vrcp.f32 (!%p826_p6), %v589_v32 }
 0x178   : > { %v604_v33 = vpop.permute.xlu1 (!%p826_p6), %603 }
 0x179   : > { %v594_v34 = vpop.permute.xlu0 (!%p826_p6), %593  ;;  %969 = vrcp.f32 (!%p826_p6), %v604_v33 }
 0x17a   : > { %971 = vrcp.f32 (!%p826_p6), %v594_v34 }
 0x17f   : > { %v966_v35 = vpop.eup (!%p826_p6), %965 }
 0x180   : > { %v968_v38 = vpop.eup (!%p826_p6), %967 }
 0x183   : > { %v970_v41 = vpop.eup (!%p826_p6), %969 }
 0x184   : > { %v972_v42 = vpop.eup (!%p826_p6), %971 }
 0x1ea   : > { %v905_v8 = vpop.f32.mrb[0].mxu1  ;;  %577 = sbr.rel (%p826_p6) target bundleno = 727 (0x2d7), region = 56 }
 0x1eb   : > { %v568_v11 = vadd.f32 %v905_v8, %v507_v6  ;;  %v551_v12 = vpop.f32.mrb[1].mxu1 }
 0x1ec   : > { %v566_v14 = vadd.f32 %v551_v12, %v505_v7  ;;  %v906_v15 = vpop.f32.mrb[2].mxu1 }
 0x1ed   : > { %572 = vst [vmem:[#allocation2 + $0x10] sm:$0xff] %v568_v11  ;;  %v569_v16 = vadd.f32 %v906_v15, %v508_v9  ;;  %v554_v17 = vpop.f32.mrb[3].mxu1 }
 0x1ee   : > { %570 = vst [vmem:[#allocation2] sm:$0xff] %v566_v14  ;;  %v567_v18 = vadd.f32 %v554_v17, %v506_v13 }
 0x1ef   : > { %573 = vst [vmem:[#allocation2 + $0x18] sm:$0xff] %v569_v16 }
 0x1f0   : > { %571 = vst [vmem:[#allocation2 + $0x8] sm:$0xff] %v567_v18 }
 0x1f4   : > { %v580_v36 = vld [vmem:[#allocation2 + $0x10] sm:$0xff] }
 0x1f5   : > { %v578_v39 = vld [vmem:[#allocation2] sm:$0xff]  ;;  %v611_v43 = vmul.f32 %v966_v35, %v580_v36 }
 0x1f6   : > { %v581_v37 = vld [vmem:[#allocation2 + $0x18] sm:$0xff]  ;;  %v607_v45 = vmul.f32 %v968_v38, %v578_v39 }
 0x1f7   : > { %v579_v40 = vld [vmem:[#allocation2 + $0x8] sm:$0xff]  ;;  %v613_v44 = vmul.f32 %v970_v41, %v581_v37 }
 0x1f8   : > { %v609_v46 = vmul.f32 %v972_v42, %v579_v40 }
 0x1f9   : > { %v615_v47 = vpack.c.bf16 %v613_v44, %v611_v43 }
 0x1fa   : > { %v614_v48 = vpack.c.bf16 %v609_v46, %v607_v45 }
 0x1fc   : > { %923 = vmatprep.mubr.bf16.mxu0 %v614_v48 }
 0x1fd   : > { %924 = vmatmul.mubr.bf16.vlgmr.msra.gmra.mrb[0].mxu0 %v615_v47 }
 0x2d0   : > { %v925_v50 = vpop.f32.mrb[0].mxu0 }
 0x2d1   : > { %v730_v51 = vadd.f32 %v925_v50, %v827_v49  ;;  %v721_v52 = vpop.f32.mrb[1].mxu0 }
 0x2d2   : > { %v722_v53 = vadd.f32 %v827_v49, %v721_v52  ;;  %v926_v54 = vpop.f32.mrb[2].mxu0 }
 0x2d3   : > { %738 = vst [vmem:[#allocation3 + $0x10] sm:$0xff] %v730_v51  ;;  %v733_v55 = vadd.f32 %v926_v54, %v827_v49  ;;  %v724_v56 = vpop.f32.mrb[3].mxu0 }
 0x2d4   : > { %736 = vst [vmem:[#allocation3] sm:$0xff] %v722_v53  ;;  %v725_v57 = vadd.f32 %v827_v49, %v724_v56 }
 0x2d5   : > { %739 = vst [vmem:[#allocation3 + $0x18] sm:$0xff] %v733_v55 }
 0x2d6   : > { %737 = vst [vmem:[#allocation3 + $0x8] sm:$0xff] %v725_v57 }
 0x2d7 PF: > { %p931_p7 = scmp.eq.s32.totalorder %s1062_s25, 2  ;;  %s1013_s22 = smov [#allocation3]  }
 0x2d8   : > { %s746_s23 = sshll.u32 %s1013_s22, 4  ;;  %s747_s23 = int_to_ptr.vmem [resolvable:$true] %s746_s23 }
 0x2d9   : > { %s973_s26 = scalar_lea.vmem %s747_s23, 512  ;;  %p980_p11 = scmp.lt.s32.totalorder %s747_s23, %s747_s23 }
 0x2da   : > { %p974_p8 = scmp.ne.s32.totalorder %s747_s23, %s973_s26  ;;  %p981_p12 = scmp.lt.s32.totalorder %s973_s26, %s973_s26 }
 0x2dc   : > { %p975_p9 = pnand %p974_p8, %p931_p7  ;;  %p982_p13 = por %p981_p12, %p980_p11 }
 0x2de   : > { %p976_p10 = pneg %p975_p9 }
 0x2e0   : > { %p983_p0 = pnand %p982_p13, %p976_p10 }
 0x2e2   : > { %986 = shalt.err (!%p983_p0)
}
 0x2e3   : > { %s987_s29 = scalar_lea.hbm %s1167_s7, 512 }
 0x2e4   : > { %p988_p1 = scmp.ne.s32.totalorder %s1167_s7, %s987_s29  ;;  %p993_p4 = scmp.lt.u32.totalorder %s987_s29, %s1167_s7 }
 0x2e6   : > { %p989_p2 = pnand %p988_p1, %p931_p7 }
 0x2e8   : > { %p990_p3 = pneg %p989_p2 }
 0x2ea   : > { %p995_p5 = pnand %p993_p4, %p990_p3 }
 0x2ec   : > { %998 = shalt.err (!%p995_p5)
}
 0x2ed   : > { %s1014_s11 = smov 128   ;;  %s1015_s12 = smov 8  }
 0x2ee   : > { %928 = dma.vmem_to_hbm [thread:$0]  (%p931_p7), %s747_s23, 512, %s1167_s7, [#allocation4], %s1014_s11, %s1014_s11, %s1015_s12  }
 0x2ef   : > { %1004 = dma.done.wait (%p931_p7), [#allocation4], 512  }
 0x2f0   : > { %1006 = vsyncadd (%p931_p7), [#allocation4], 4294966784 }
 0x2f1 PF: > { %s18_s24 = sadd.s32 1, %s1009_s24  }
 0x2f2   : > { %p15_p6 = scmp.ge.s32.totalorder %s18_s24, 5  }
 0x2f4   :  { %17 = sbr.rel (!%p15_p6) target bundleno = 1 (0x1), region = 86 }
 0x2fb   :  { %762 = vsyncpa [#allocation4], 1 }
 0x2fc   :  { %764 = vsyncpa [#allocation4 + $0x1], 1 }

// kernel: _bag_pallas.1
= control target key start
LH: loop header
LB: loop body
LE: loop exit
PB: predicated region body
PF: predicated region fallthrough
CT: control target
= control target key end

     0   :  { %12 = vsyncpa [#allocation4], 0  ;;  %s1056_s24 = smov 0   ;;  %s1160_s0 = inlined_call_operand.vmem [shape: bf16[384,16], index: 0, kind: input, shape index: {}]   ;;  %s1161_s1 = inlined_call_operand.vmem [shape: bf16[16,128], index: 1, kind: input, shape index: {}]   ;;  %s1162_s2 = inlined_call_operand.vmem [shape: f32[1,128], index: 2, kind: input, shape index: {}]   ;;  %s1163_s3 = inlined_call_operand.vmem [shape: s8[32,384], index: 3, kind: input, shape index: {}]   ;;  %s1164_s4 = inlined_call_operand.vmem [shape: f32[32,1], index: 4, kind: input, shape index: {}]   ;;  %s1165_s5 = inlined_call_operand.vmem [shape: bf16[128,128], index: 5, kind: input, shape index: {}]   ;;  %s1166_s6 = inlined_call_operand.vmem [shape: f32[1,128], index: 6, kind: input, shape index: {}]   ;;  %s1167_s7 = inlined_call_operand.hbm [shape: f32[32,128], index: 7, kind: output, shape index: {}]  }
   0x1 LB: > { %s1062_s25 = sadd.s32 4294967295, %s1009_s24   ;;  %p803_p0 = scmp.ge.s32.totalorder %s1009_s24, 1  ;;  %s1009_s24 = sphi %s1056_s24, %s18_s24  }
   0x2   : > { %p243_p1 = scmp.lt.s32.totalorder %s1009_s24, 4 }
   0x4   : > { %p244_p2 = pnand %p803_p0, %p243_p1 }
   0x5   : > { %s804_s26 = sshll.u32 (!%p244_p2), %s1062_s25, 4  ;;  %p280_p3 = scmp.lt.s32.totalorder (!%p244_p2), %s1062_s25, 2 }
   0x6   : > { %247 = sbr.rel (%p244_p2) target bundleno = 753 (0x2f1), region = 48  ;;  %p275_p4 = scmp.lt.s32.totalorder (!%p244_p2), %s804_s26, 47 }
   0x7   : > { %p807_p5 = scmp.ne.s32.totalorder (!%p244_p2), %s1062_s25, 0 }
   0xd   : > { %s281_s27 = scalar_select %p280_p3, %s1062_s25, 2 }
   0xe   : > { %s1169_s26 = smov (!%p275_p4, %s804_s26), 47  ;;  %288 = sbr.rel (%p807_p5) target bundleno = 21 (0x15), region = 52 }
   0xf   : > { %s806_s28 = sshll.u32 %s281_s27, 3  ;;  %s805_s29 = sshll.u32 %s1169_s26, 2  ;;  %v1011_v0 = vmov (!%p807_p5), 0.0  }
  0x10   : > { %s283_s9 = scalar_lea.vmem %s1163_s3, %s806_s28  ;;  %s278_s12 = scalar_lea.vmem %s1160_s0, %s805_s29  ;;  %289 = vst [vmem:[#allocation2] sm:$0xff] (!%p807_p5), %v1011_v0  ;;  %290 = vst [vmem:[#allocation2 + $0x8] sm:$0xff] (!%p807_p5), %v1011_v0 }
  0x11   : > { %291 = vst [vmem:[#allocation2 + $0x10] sm:$0xff] (!%p807_p5), %v1011_v0  ;;  %292 = vst [vmem:[#allocation2 + $0x18] sm:$0xff] (!%p807_p5), %v1011_v0 }
  0x15 PF: > { %v946_v1 = vld [vmem:[%s1161_s1] sm:$0xff]   ;;  %vm364_vm0 = vcmask 130048   ;;  %v948_v3 = vld [vmem:[%s278_s12 + $0x8] sm:$0xff]   ;;  %v949_v4 = vld [vmem:[%s278_s12 + $0x10] sm:$0xff]   ;;  %p826_p6 = scmp.ne.s32.totalorder %s1062_s25, 2 }
  0x16   : > { %v947_v2 = vld [vmem:[%s278_s12] sm:$0xff]   ;;  %869 = vmatprep.subr.bf16.mxu0 %v946_v1  ;;  %v950_v5 = vld [vmem:[%s278_s12 + $0x18] sm:$0xff]   ;;  %v952_v7 = vld [vmem:[%s278_s12 + $0x28] sm:$0xff]  }
  0x17   : > { %870 = vmatpush3.bf16.msra.mxu0 %v946_v1  ;;  %871 = vmatprep.mubr.msk.bf16.mxu0 %vm364_vm0, %v947_v2  ;;  %v951_v6 = vld [vmem:[%s278_s12 + $0x20] sm:$0xff]   ;;  %v953_v8 = vld [vmem:[%s278_s12 + $0x30] sm:$0xff]   ;;  %v954_v9 = vld [vmem:[%s278_s12 + $0x38] sm:$0xff]  }
  0x18   : > { %v1087_v10 = vld [vmem:[%s283_s9] sm:$0xff] }
  0x19   : > { %v503_v11 = vunpack.c.l.s8.bf16 %v1087_v10  ;;  %v808_v12 = vld [vmem:[%s1162_s2] ss:$0 sm:$0xff] }
  0x1a   : > { %872 = vmatmul.mubr.msk.bf16.vlgmr.msra.gmra.mrb[0].mxu0 %vm364_vm0, %v948_v3 }
  0x1b   : > { %875 = vmatprep.mubr.msk.bf16.mxu0 %vm364_vm0, %v949_v4  ;;  %903 = vmatprep.mubr.bf16.mxu1 %v503_v11 }
  0x22   : > { %876 = vmatmul.mubr.msk.bf16.gmra.mrb[4].mxu0 %vm364_vm0, %v950_v5  ;;  %v504_v5 = vunpack.c.h.s8.bf16 %v1087_v10  ;;  %v584_v10 = vld [vmem:[%s1164_s4 + $0x10] sm:$0xff] (!%p826_p6) }
  0x23   : > { %879 = vmatprep.mubr.msk.bf16.mxu0 %vm364_vm0, %v951_v6  ;;  %v507_v6 = vld [vmem:[#allocation2 + $0x10] sm:$0xff] }
  0x2a   : > { %880 = vmatmul.mubr.msk.bf16.gmra.mrb[8].mxu0 %vm364_vm0, %v952_v7  ;;  %v505_v7 = vld [vmem:[#allocation2] sm:$0xff] }
  0x2b   : > { %883 = vmatprep.mubr.msk.bf16.mxu0 %vm364_vm0, %v953_v8 }
  0x32   : > { %884 = vmatmul.mubr.msk.bf16.gmra.mrb[12].mxu0 %vm364_vm0, %v954_v9  ;;  %v508_v9 = vld [vmem:[#allocation2 + $0x18] sm:$0xff] }
  0xed   : > { %v873_v13 = vpop.f32.mrb[0].mxu0 }
  0xee   : > { %v432_v14 = vadd.f32 %v873_v13, %v808_v12  ;;  %v423_v15 = vpop.f32.mrb[1].mxu0  ;;  %v506_v13 = vld [vmem:[#allocation2 + $0x8] sm:$0xff] }
  0xef   : > { %v424_v16 = vadd.f32 %v808_v12, %v423_v15  ;;  %v874_v17 = vpop.f32.mrb[2].mxu0 }
  0xf0   : > { %v435_v18 = vadd.f32 %v874_v17, %v808_v12  ;;  %v426_v19 = vpop.f32.mrb[3].mxu0  ;;  %v488_v21 = vmax.f32 %v432_v14, 0.0 }
  0xf1   : > { %v427_v20 = vadd.f32 %v808_v12, %v426_v19  ;;  %v486_v23 = vmax.f32 %v424_v16, 0.0  ;;  %v582_v19 = vld [vmem:[%s1164_s4] sm:$0xff] (!%p826_p6) }
  0xf2   : > { %v489_v22 = vmax.f32 %v435_v18, 0.0 }
  0xf3   : > { %v487_v24 = vmax.f32 %v427_v20, 0.0  ;;  %v1012_v20 = vmov (!%p826_p6), 0  }
  0xf4   : > { %v510_v25 = vpack.c.bf16 %v489_v22, %v488_v21  ;;  %956 = vset.pattern.permute.xlu1 (!%p826_p6), %v1012_v20  ;;  %955 = vset.pattern.permute.xlu0 (!%p826_p6), %v1012_v20  ;;  %v585_v21 = vld [vmem:[%s1164_s4 + $0x18] sm:$0xff] (!%p826_p6)  ;;  %v583_v22 = vld [vmem:[%s1164_s4 + $0x8] sm:$0xff] (!%p826_p6) }
  0xf5   : > { %v877_v26 = vpop.f32.mrb[4].mxu0  ;;  %v509_v27 = vpack.c.bf16 %v487_v24, %v486_v23  ;;  %598 = vperm.xlu1 (!%p826_p6), %956, %v584_v10   ;;  %588 = vperm.xlu0 (!%p826_p6), %955, %v582_v19   ;;  %v957_v23 = vld [vmem:[%s1165_s5] sm:$0xff] (!%p826_p6)   ;;  %v958_v24 = vld [vmem:[%s1165_s5 + $0x8] sm:$0xff] (!%p826_p6)  }
  0xf6   : > { %v448_v28 = vadd.f32 %v877_v26, %v808_v12  ;;  %v439_v29 = vpop.f32.mrb[5].mxu0  ;;  %907 = vmatprep.subr.bf16.mxu0 (!%p826_p6), %v957_v23  ;;  %v960_v26 = vld [vmem:[%s1165_s5 + $0x18] sm:$0xff] (!%p826_p6)  }
  0xf7   : > { %v440_v30 = vadd.f32 %v808_v12, %v439_v29  ;;  %v878_v31 = vpop.f32.mrb[6].mxu0  ;;  %887 = vmatprep.subr.bf16.mxu1 %v509_v27  ;;  %908 = vmatpush3.bf16.msra.mxu0 (!%p826_p6), %v957_v23  ;;  %v963_v29 = vld [vmem:[%s1165_s5 + $0x30] sm:$0xff] (!%p826_p6)  }
  0xf8   : > { %v451_v32 = vadd.f32 %v878_v31, %v808_v12  ;;  %v442_v33 = vpop.f32.mrb[7].mxu0  ;;  %888 = vmatpush3.bf16.msra.mxu1 %v509_v27  ;;  %v492_v35 = vmax.f32 %v448_v28, 0.0  ;;  %909 = vmatprep.subr.bf16.mxu0 (!%p826_p6), %v958_v24  ;;  %v961_v27 = vld [vmem:[%s1165_s5 + $0x20] sm:$0xff] (!%p826_p6)   ;;  %v962_v28 = vld [vmem:[%s1165_s5 + $0x28] sm:$0xff] (!%p826_p6)  }
  0xf9   : > { %v443_v34 = vadd.f32 %v808_v12, %v442_v33  ;;  %889 = vmatprep.subr.bf16.mxu1 %v510_v25  ;;  %v490_v37 = vmax.f32 %v440_v30, 0.0  ;;  %603 = vperm.xlu1 (!%p826_p6), %956, %v585_v21   ;;  %v964_v30 = vld [vmem:[%s1165_s5 + $0x38] sm:$0xff] (!%p826_p6)  }
  0xfa   : > { %v493_v36 = vmax.f32 %v451_v32, 0.0  ;;  %593 = vperm.xlu0 (!%p826_p6), %955, %v583_v22  }
  0xfb   : > { %v491_v38 = vmax.f32 %v443_v34, 0.0  ;;  %910 = vmatpush3.bf16.msra.mxu0 (!%p826_p6), %v958_v24 }
  0xfc   : > { %v512_v39 = vpack.c.bf16 %v493_v36, %v492_v35  ;;  %890 = vmatpush3.bf16.msra.mxu1 %v510_v25  ;;  %v959_v25 = vld [vmem:[%s1165_s5 + $0x10] sm:$0xff] (!%p826_p6)  }
  0xfd   : > { %v511_v40 = vpack.c.bf16 %v491_v38, %v490_v37  ;;  %v881_v41 = vpop.f32.mrb[8].mxu0  ;;  %911 = vmatprep.subr.bf16.mxu0 (!%p826_p6), %v959_v25 }
  0xfe   : > { %v464_v42 = vadd.f32 %v881_v41, %v808_v12  ;;  %v455_v43 = vpop.f32.mrb[9].mxu0 }
  0xff   : > { %v456_v44 = vadd.f32 %v808_v12, %v455_v43  ;;  %v882_v45 = vpop.f32.mrb[10].mxu0  ;;  %891 = vmatprep.subr.bf16.mxu1 %v511_v40  ;;  %912 = vmatpush3.bf16.msra.mxu0 (!%p826_p6), %v959_v25 }
 0x100   : > { %v467_v46 = vadd.f32 %v882_v45, %v808_v12  ;;  %v458_v47 = vpop.f32.mrb[11].mxu0  ;;  %892 = vmatpush3.bf16.msra.mxu1 %v511_v40  ;;  %v496_v49 = vmax.f32 %v464_v42, 0.0  ;;  %913 = vmatprep.subr.bf16.mxu0 (!%p826_p6), %v960_v26 }
 0x101   : > { %v459_v48 = vadd.f32 %v808_v12, %v458_v47  ;;  %893 = vmatprep.subr.bf16.mxu1 %v512_v39  ;;  %v494_v51 = vmax.f32 %v456_v44, 0.0 }
 0x102   : > { %v497_v50 = vmax.f32 %v467_v46, 0.0 }
 0x103   : > { %v495_v52 = vmax.f32 %v459_v48, 0.0  ;;  %914 = vmatpush3.bf16.msra.mxu0 (!%p826_p6), %v960_v26 }
 0x104   : > { %v514_v53 = vpack.c.bf16 %v497_v50, %v496_v49  ;;  %894 = vmatpush3.bf16.msra.mxu1 %v512_v39  ;;  %915 = vmatprep.subr.bf16.mxu0 (!%p826_p6), %v961_v27  ;;  %v827_v49 = vld [vmem:[%s1166_s6] ss:$0 sm:$0xff] (!%p826_p6) }
 0x105   : > { %v513_v54 = vpack.c.bf16 %v495_v52, %v494_v51  ;;  %v885_v55 = vpop.f32.mrb[12].mxu0 }
 0x106   : > { %v480_v56 = vadd.f32 %v885_v55, %v808_v12  ;;  %v471_v57 = vpop.f32.mrb[13].mxu0 }
 0x107   : > { %v472_v58 = vadd.f32 %v808_v12, %v471_v57  ;;  %v886_v59 = vpop.f32.mrb[14].mxu0  ;;  %895 = vmatprep.subr.bf16.mxu1 %v513_v54  ;;  %916 = vmatpush3.bf16.msra.mxu0 (!%p826_p6), %v961_v27 }
 0x108   : > { %v483_v60 = vadd.f32 %v886_v59, %v808_v12  ;;  %v474_v61 = vpop.f32.mrb[15].mxu0  ;;  %896 = vmatpush3.bf16.msra.mxu1 %v513_v54  ;;  %v500_v63 = vmax.f32 %v480_v56, 0.0  ;;  %917 = vmatprep.subr.bf16.mxu0 (!%p826_p6), %v962_v28 }
 0x109   : > { %v475_v62 = vadd.f32 %v808_v12, %v474_v61  ;;  %897 = vmatprep.subr.bf16.mxu1 %v514_v53  ;;  %v498_v1 = vmax.f32 %v472_v58, 0.0 }
 0x10a   : > { %v501_v0 = vmax.f32 %v483_v60, 0.0 }
 0x10b   : > { %v499_v2 = vmax.f32 %v475_v62, 0.0  ;;  %918 = vmatpush3.bf16.msra.mxu0 (!%p826_p6), %v962_v28 }
 0x10c   : > { %v516_v3 = vpack.c.bf16 %v501_v0, %v500_v63  ;;  %898 = vmatpush3.bf16.msra.mxu1 %v514_v53  ;;  %919 = vmatprep.subr.bf16.mxu0 (!%p826_p6), %v963_v29 }
 0x10d   : > { %v515_v4 = vpack.c.bf16 %v499_v2, %v498_v1 }
 0x10f   : > { %899 = vmatprep.subr.bf16.mxu1 %v515_v4  ;;  %920 = vmatpush3.bf16.msra.mxu0 (!%p826_p6), %v963_v29 }
 0x110   : > { %900 = vmatpush3.bf16.msra.mxu1 %v515_v4  ;;  %921 = vmatprep.subr.bf16.mxu0 (!%p826_p6), %v964_v30 }
 0x111   : > { %901 = vmatprep.subr.bf16.mxu1 %v516_v3 }
 0x113   : > { %922 = vmatpush3.bf16.msra.mxu0 (!%p826_p6), %v964_v30 }
 0x114   : > { %902 = vmatpush3.bf16.msra.mxu1 %v516_v3 }
 0x117   : > { %904 = vmatmul.mubr.bf16.vlgmr.msra.gmra.mrb[0].mxu1 %v504_v5 }
 0x174   : > { %v599_v31 = vpop.permute.xlu1 (!%p826_p6), %598  ;;  %v589_v32 = vpop.permute.xlu0 (!%p826_p6), %588 }
 0x175   : > { %965 = vrcp.f32 (!%p826_p6), %v599_v31 }
 0x176   : > { %967 = vrcp.f32 (!%p826_p6), %v589_v32 }
 0x178   : > { %v604_v33 = vpop.permute.xlu1 (!%p826_p6), %603 }
 0x179   : > { %v594_v34 = vpop.permute.xlu0 (!%p826_p6), %593  ;;  %969 = vrcp.f32 (!%p826_p6), %v604_v33 }
 0x17a   : > { %971 = vrcp.f32 (!%p826_p6), %v594_v34 }
 0x17f   : > { %v966_v35 = vpop.eup (!%p826_p6), %965 }
 0x180   : > { %v968_v38 = vpop.eup (!%p826_p6), %967 }
 0x183   : > { %v970_v41 = vpop.eup (!%p826_p6), %969 }
 0x184   : > { %v972_v42 = vpop.eup (!%p826_p6), %971 }
 0x1ea   : > { %v905_v8 = vpop.f32.mrb[0].mxu1  ;;  %577 = sbr.rel (%p826_p6) target bundleno = 727 (0x2d7), region = 56 }
 0x1eb   : > { %v568_v11 = vadd.f32 %v905_v8, %v507_v6  ;;  %v551_v12 = vpop.f32.mrb[1].mxu1 }
 0x1ec   : > { %v566_v14 = vadd.f32 %v551_v12, %v505_v7  ;;  %v906_v15 = vpop.f32.mrb[2].mxu1 }
 0x1ed   : > { %572 = vst [vmem:[#allocation2 + $0x10] sm:$0xff] %v568_v11  ;;  %v569_v16 = vadd.f32 %v906_v15, %v508_v9  ;;  %v554_v17 = vpop.f32.mrb[3].mxu1 }
 0x1ee   : > { %570 = vst [vmem:[#allocation2] sm:$0xff] %v566_v14  ;;  %v567_v18 = vadd.f32 %v554_v17, %v506_v13 }
 0x1ef   : > { %573 = vst [vmem:[#allocation2 + $0x18] sm:$0xff] %v569_v16 }
 0x1f0   : > { %571 = vst [vmem:[#allocation2 + $0x8] sm:$0xff] %v567_v18 }
 0x1f4   : > { %v580_v36 = vld [vmem:[#allocation2 + $0x10] sm:$0xff] }
 0x1f5   : > { %v578_v39 = vld [vmem:[#allocation2] sm:$0xff]  ;;  %v611_v43 = vmul.f32 %v966_v35, %v580_v36 }
 0x1f6   : > { %v581_v37 = vld [vmem:[#allocation2 + $0x18] sm:$0xff]  ;;  %v607_v45 = vmul.f32 %v968_v38, %v578_v39 }
 0x1f7   : > { %v579_v40 = vld [vmem:[#allocation2 + $0x8] sm:$0xff]  ;;  %v613_v44 = vmul.f32 %v970_v41, %v581_v37 }
 0x1f8   : > { %v609_v46 = vmul.f32 %v972_v42, %v579_v40 }
 0x1f9   : > { %v615_v47 = vpack.c.bf16 %v613_v44, %v611_v43 }
 0x1fa   : > { %v614_v48 = vpack.c.bf16 %v609_v46, %v607_v45 }
 0x1fc   : > { %923 = vmatprep.mubr.bf16.mxu0 %v614_v48 }
 0x1fd   : > { %924 = vmatmul.mubr.bf16.vlgmr.msra.gmra.mrb[0].mxu0 %v615_v47 }
 0x2d0   : > { %v925_v50 = vpop.f32.mrb[0].mxu0 }
 0x2d1   : > { %v730_v51 = vadd.f32 %v925_v50, %v827_v49  ;;  %v721_v52 = vpop.f32.mrb[1].mxu0 }
 0x2d2   : > { %v722_v53 = vadd.f32 %v827_v49, %v721_v52  ;;  %v926_v54 = vpop.f32.mrb[2].mxu0 }
 0x2d3   : > { %738 = vst [vmem:[#allocation3 + $0x10] sm:$0xff] %v730_v51  ;;  %v733_v55 = vadd.f32 %v926_v54, %v827_v49  ;;  %v724_v56 = vpop.f32.mrb[3].mxu0 }
 0x2d4   : > { %736 = vst [vmem:[#allocation3] sm:$0xff] %v722_v53  ;;  %v725_v57 = vadd.f32 %v827_v49, %v724_v56 }
 0x2d5   : > { %739 = vst [vmem:[#allocation3 + $0x18] sm:$0xff] %v733_v55 }
 0x2d6   : > { %737 = vst [vmem:[#allocation3 + $0x8] sm:$0xff] %v725_v57 }
 0x2d7 PF: > { %p931_p7 = scmp.eq.s32.totalorder %s1062_s25, 2  ;;  %s1013_s22 = smov [#allocation3]  }
 0x2d8   : > { %s746_s23 = sshll.u32 %s1013_s22, 4  ;;  %s747_s23 = int_to_ptr.vmem [resolvable:$true] %s746_s23 }
 0x2d9   : > { %s973_s26 = scalar_lea.vmem %s747_s23, 512  ;;  %p980_p11 = scmp.lt.s32.totalorder %s747_s23, %s747_s23 }
 0x2da   : > { %p974_p8 = scmp.ne.s32.totalorder %s747_s23, %s973_s26  ;;  %p981_p12 = scmp.lt.s32.totalorder %s973_s26, %s973_s26 }
 0x2dc   : > { %p975_p9 = pnand %p974_p8, %p931_p7  ;;  %p982_p13 = por %p981_p12, %p980_p11 }
 0x2de   : > { %p976_p10 = pneg %p975_p9 }
 0x2e0   : > { %p983_p0 = pnand %p982_p13, %p976_p10 }
 0x2e2   : > { %986 = shalt.err (!%p983_p0)
}
 0x2e3   : > { %s987_s29 = scalar_lea.hbm %s1167_s7, 512 }
 0x2e4   : > { %p988_p1 = scmp.ne.s32.totalorder %s1167_s7, %s987_s29  ;;  %p993_p4 = scmp.lt.u32.totalorder %s987_s29, %s1167_s7 }
 0x2e6   : > { %p989_p2 = pnand %p988_p1, %p931_p7 }
 0x2e8   : > { %p990_p3 = pneg %p989_p2 }
 0x2ea   : > { %p995_p5 = pnand %p993_p4, %p990_p3 }
 0x2ec   : > { %998 = shalt.err (!%p995_p5)
}
 0x2ed   : > { %s1014_s11 = smov 128   ;;  %s1015_s12 = smov 8  }
 0x2ee   : > { %928 = dma.vmem_to_hbm [thread:$0]  (%p931_p7), %s747_s23, 512, %s1167_s7, [#allocation4], %s1014_s11, %s1014_s11, %s1015_s12  }
 0x2ef   : > { %1004 = dma.done.wait (%p931_p7), [#allocation4], 512  }
 0x2f0   : > { %1006 = vsyncadd (%p931_p7), [#allocation4], 4294966784 }
 0x2f1 PF: > { %s18_s24 = sadd.s32 1, %s1009_s24  }
 0x2f2   : > { %p15_p6 = scmp.ge.s32.totalorder %s18_s24, 5  }
 0x2f4   :  { %17 = sbr.rel (!%p15_p6) target bundleno = 1 (0x1), region = 86 }
 0x2fb   :  { %762 = vsyncpa [#allocation4], 1 }
 0x2fc   :  { %764 = vsyncpa [#allocation4 + $0x1], 1 }

</bundles_post_ra>
